<compile_context>
chip_gen: v6e
topology: v6e:2x2x1
jax: 0.10.0
libtpu: 0.0.40
codegen_flags: <defaults>
</compile_context>

<pallas_src>
import functools

import jax
import jax.numpy as jnp
from jax.experimental import pallas as pl
from jax.experimental.pallas import tpu as pltpu

_LANES = 128
_SUBLANES = 8


def _kp2d_loss_kernel(pred_ref, tgt_ref, conf_ref, out_ref, acc_ref, *, inv_count):
    i = pl.program_id(0)

    @pl.when(i == 0)
    def _init():
        acc_ref[...] = jnp.zeros_like(acc_ref)

    # Hot path: pure VPU work on lane-dense (tile_rows, 128) blocks.
    p = pred_ref[...].astype(jnp.float32)
    t = tgt_ref[...].astype(jnp.float32)
    c = conf_ref[...].astype(jnp.float32)
    d = p - t
    w = c * d * d

    # Vreg-wise partial sum: (tile_rows,128) -> (tile_rows/8, 8, 128), add over
    # the leading axis. This is a stack of (8,128) element-wise adds (VPU only);
    # the cross-lane/sublane reduce happens exactly once, at finalize.
    acc_ref[...] += jnp.sum(w.reshape(-1, _SUBLANES, _LANES), axis=0)

    @pl.when(i == pl.num_programs(0) - 1)
    def _finalize():
        out_ref[0, 0] = jnp.sum(acc_ref[...]) * inv_count


def keypoints_2d_loss(pred, target, *, max_tile_rows=1024):
    """JAX/Pallas equivalent of Keypoints2DLoss.forward(pred, target)."""
    B, K, D1 = target.shape
    D = D1 - 1
    assert pred.shape == (B, K, D), (pred.shape, target.shape)

    # --- Layout plumbing only (no compute hoisted into the wrapper). ---
    # Broadcast confidence over the coordinate axis so the flattened conf
    # array lines up element-for-element with flattened pred / target-xy.
    tgt_xy = target[..., :D]
    conf = jnp.broadcast_to(target[..., D:], (B, K, D))

    n = B * K * D
    rows_min = -(-n // _LANES)                            # rows of 128 lanes
    rows_aligned = -(-rows_min // _SUBLANES) * _SUBLANES  # multiple of 8
    max_tile_rows = max(_SUBLANES, (max_tile_rows // _SUBLANES) * _SUBLANES)
    tile_rows = min(max_tile_rows, rows_aligned)          # multiple of 8
    rows = -(-rows_aligned // tile_rows) * tile_rows      # multiple of tile
    n_pad = rows * _LANES

    def densify(x):
        x = x.reshape(-1)
        x = jnp.pad(x, (0, n_pad - n))  # zero padding -> contributes 0 to sum
        return x.reshape(rows, _LANES)

    pred_d = densify(pred)
    tgt_d = densify(tgt_xy)
    conf_d = densify(conf)

    # MSELoss(reduction='none') * conf, then .mean() divides by B*K*D.
    inv_count = 1.0 / float(n)
    kernel = functools.partial(_kp2d_loss_kernel, inv_count=inv_count)

    grid = (rows // tile_rows,)
    out = pl.pallas_call(
        kernel,
        out_shape=jax.ShapeDtypeStruct((1, 1), jnp.float32),
        grid=grid,
        in_specs=[
            pl.BlockSpec((tile_rows, _LANES), lambda i: (i, 0)),
            pl.BlockSpec((tile_rows, _LANES), lambda i: (i, 0)),
            pl.BlockSpec((tile_rows, _LANES), lambda i: (i, 0)),
        ],
        out_specs=pl.BlockSpec((1, 1), lambda i: (0, 0), memory_space=pltpu.SMEM),
        scratch_shapes=[pltpu.VMEM((_SUBLANES, _LANES), jnp.float32)],
        compiler_params=pltpu.CompilerParams(
            dimension_semantics=("arbitrary",),
            vmem_limit_bytes=32 * 1024 * 1024,  # 3 inputs x 2 bufs x tile << 32 MiB
        ),
    )(pred_d, tgt_d, conf_d)
    return out[0, 0]


def _reference(pred, target):
    D = target.shape[-1] - 1
    conf = target[..., D:]
    diff = pred.astype(jnp.float32) - target[..., :D].astype(jnp.float32)
    return jnp.mean(conf.astype(jnp.float32) * diff * diff)


if __name__ == "__main__":
    key = jax.random.PRNGKey(0)

    # Small shapes consistent with the module: batch=2, 24 keypoints, 2D coords
    # (+1 confidence channel in target).
    B, K, D = 2, 24, 2
    k1, k2, k3 = jax.random.split(key, 3)
    pred = jax.random.normal(k1, (B, K, D), dtype=jnp.float32)
    tgt_xy = jax.random.normal(k2, (B, K, D), dtype=jnp.float32)
    conf = jax.random.uniform(k3, (B, K, 1), dtype=jnp.float32)
    target = jnp.concatenate([tgt_xy, conf], axis=-1)  # (B, K, D+1)

    loss = jax.block_until_ready(keypoints_2d_loss(pred, target))
    ref = _reference(pred, target)
    assert jnp.allclose(loss, ref, rtol=1e-5, atol=1e-6), (loss, ref)

    # Secondary check: exercises the multi-step (grid > 1) accumulation path.
    B2, K2 = 16, 256
    k4, k5, k6 = jax.random.split(jax.random.PRNGKey(1), 3)
    pred2 = jax.random.normal(k4, (B2, K2, D), dtype=jnp.float32)
    tgt2 = jnp.concatenate(
        [jax.random.normal(k5, (B2, K2, D), dtype=jnp.float32),
         jax.random.uniform(k6, (B2, K2, 1), dtype=jnp.float32)],
        axis=-1,
    )
    loss2 = jax.block_until_ready(keypoints_2d_loss(pred2, tgt2, max_tile_rows=16))
    ref2 = _reference(pred2, tgt2)
    assert jnp.allclose(loss2, ref2, rtol=1e-5, atol=1e-6), (loss2, ref2)

    print("KERNEL_OK")
</pallas_src>

<mosaic_0001>
module attributes {stable_mosaic.version = 11 : i64} {
  func.func @_kp2d_loss_kernel(%arg0: i32, %arg1: memref<8x128xf32, #tpu.memory_space<vmem>>, %arg2: memref<8x128xf32, #tpu.memory_space<vmem>>, %arg3: memref<8x128xf32, #tpu.memory_space<vmem>>, %arg4: memref<1x1xf32, #tpu.memory_space<smem>>, %arg5: memref<8x128xf32, #tpu.memory_space<vmem>>) attributes {dimension_semantics = [#tpu.dimension_semantics<arbitrary>], iteration_bounds = array<i64: 1>, scalar_prefetch = 0 : i64, scratch_operands = 1 : i64, tpu.core_type = #tpu.core_type<tc>, window_params = [{transform_indices = @transform_0, window_bounds = array<i64: 8, 128>}, {transform_indices = @transform_1, window_bounds = array<i64: 8, 128>}, {transform_indices = @transform_2, window_bounds = array<i64: 8, 128>}, {transform_indices = @transform_3, window_bounds = array<i64: 1, 1>}]} {
    %c0_i32 = arith.constant 0 : i32
    %0 = arith.cmpi eq, %arg0, %c0_i32 : i32
    %1 = arith.extui %0 : i1 to i32
    %c0_i32_0 = arith.constant 0 : i32
    %2 = arith.cmpi ne, %1, %c0_i32_0 : i32
    scf.if %2 {
      %cst_12 = arith.constant 0.000000e+00 : f32
      %17 = vector.broadcast %cst_12 : f32 to vector<8x128xf32>
      %c0_13 = arith.constant 0 : index
      %c0_14 = arith.constant 0 : index
      %18 = vector.load %arg5[%c0_13, %c0_14] : memref<8x128xf32, #tpu.memory_space<vmem>>, vector<8x128xf32>
      tpu.vector_store %arg5[%c0_13, %c0_14], %17 {strides = array<i32>} : memref<8x128xf32, #tpu.memory_space<vmem>>, vector<8x128xf32>,
    } else {
    }
    %c0 = arith.constant 0 : index
    %c0_1 = arith.constant 0 : index
    %3 = vector.load %arg1[%c0, %c0_1] : memref<8x128xf32, #tpu.memory_space<vmem>>, vector<8x128xf32>
    %c0_2 = arith.constant 0 : index
    %c0_3 = arith.constant 0 : index
    %4 = vector.load %arg2[%c0_2, %c0_3] : memref<8x128xf32, #tpu.memory_space<vmem>>, vector<8x128xf32>
    %c0_4 = arith.constant 0 : index
    %c0_5 = arith.constant 0 : index
    %5 = vector.load %arg3[%c0_4, %c0_5] : memref<8x128xf32, #tpu.memory_space<vmem>>, vector<8x128xf32>
    %6 = arith.subf %3, %4 : vector<8x128xf32>
    %7 = arith.mulf %5, %6 : vector<8x128xf32>
    %8 = arith.mulf %7, %6 : vector<8x128xf32>
    %c0_6 = arith.constant 0 : index
    %c0_7 = arith.constant 0 : index
    %9 = vector.load %arg5[%c0_6, %c0_7] : memref<8x128xf32, #tpu.memory_space<vmem>>, vector<8x128xf32>
    %10 = vector.shape_cast %8 : vector<8x128xf32> to vector<1x8x128xf32>
    %cst = arith.constant dense<0.000000e+00> : vector<8x128xf32>
    %11 = vector.multi_reduction <add>, %10, %cst [0] : vector<1x8x128xf32> to vector<8x128xf32>
    %12 = arith.addf %9, %11 : vector<8x128xf32>
    %c0_8 = arith.constant 0 : index
    %c0_9 = arith.constant 0 : index
    %13 = vector.load %arg5[%c0_8, %c0_9] : memref<8x128xf32, #tpu.memory_space<vmem>>, vector<8x128xf32>
    tpu.vector_store %arg5[%c0_8, %c0_9], %12 {strides = array<i32>} : memref<8x128xf32, #tpu.memory_space<vmem>>, vector<8x128xf32>,
    %c0_i32_10 = arith.constant 0 : i32
    %14 = arith.cmpi eq, %arg0, %c0_i32_10 : i32
    %15 = arith.extui %14 : i1 to i32
    %c0_i32_11 = arith.constant 0 : i32
    %16 = arith.cmpi ne, %15, %c0_i32_11 : i32
    scf.if %16 {
      %c0_12 = arith.constant 0 : index
      %c0_13 = arith.constant 0 : index
      %17 = vector.load %arg5[%c0_12, %c0_13] : memref<8x128xf32, #tpu.memory_space<vmem>>, vector<8x128xf32>
      %18 = vector.shape_cast %17 : vector<8x128xf32> to vector<1x8x128xf32>
      %cst_14 = arith.constant dense<0.000000e+00> : vector<1xf32>
      %19 = vector.multi_reduction <add>, %18, %cst_14 [1, 2] : vector<1x8x128xf32> to vector<1xf32>
      %20 = vector.shape_cast %19 : vector<1xf32> to vector<1x1x1xf32>
      %21 = vector.extract %20[0, 0, 0] : f32 from vector<1x1x1xf32>
      %cst_15 = arith.constant 0.010416667 : f32
      %22 = arith.mulf %21, %cst_15 : f32
      %c0_16 = arith.constant 0 : index
      %c0_17 = arith.constant 0 : index
      %23 = memref.load %arg4[%c0_16, %c0_17] : memref<1x1xf32, #tpu.memory_space<smem>>
      memref.store %22, %arg4[%c0_16, %c0_17] : memref<1x1xf32, #tpu.memory_space<smem>>
    } else {
    }
    return
  }
  func.func @transform_0(%arg0: i32) -> (i32, i32) {
    %c0_i32 = arith.constant 0 : i32
    %c0_i32_0 = arith.constant 0 : i32
    return %arg0, %c0_i32 : i32, i32
  }
  func.func @transform_1(%arg0: i32) -> (i32, i32) {
    %c0_i32 = arith.constant 0 : i32
    %c0_i32_0 = arith.constant 0 : i32
    return %arg0, %c0_i32 : i32, i32
  }
  func.func @transform_2(%arg0: i32) -> (i32, i32) {
    %c0_i32 = arith.constant 0 : i32
    %c0_i32_0 = arith.constant 0 : i32
    return %arg0, %c0_i32 : i32, i32
  }
  func.func @transform_3(%arg0: i32) -> (i32, i32) {
    %c0_i32 = arith.constant 0 : i32
    %c0_i32_0 = arith.constant 0 : i32
    %c0_i32_1 = arith.constant 0 : i32
    return %c0_i32, %c0_i32_0 : i32, i32
  }
}

</mosaic_0001>

<bundles_post_ra>
// kernel: tpu_custom_call.1
= control target key start
LH: loop header
LB: loop body
LE: loop exit
PB: predicated region body
PF: predicated region fallthrough
CT: control target
= control target key end

     0   :  { %8 = vsyncpa [#allocation4], 0  ;;  %s212_s0 = inlined_call_operand.hbm [shape: f32[8,128], index: 0, kind: input, shape index: {}]   ;;  %s213_s1 = inlined_call_operand.hbm [shape: f32[8,128], index: 1, kind: input, shape index: {}]   ;;  %s214_s2 = inlined_call_operand.hbm [shape: f32[8,128], index: 2, kind: input, shape index: {}]   ;;  %s215_s3 = inlined_call_operand.hbm [shape: f32[1,1], index: 3, kind: output, shape index: {}]  }
   0x1   :  { %9 = vsyncpa [#allocation7], 0 }
   0x2   :  { %10 = vsyncpa [#allocation5], 0  ;;  %s176_s12 = smov [#allocation6]   ;;  %s177_s14 = smov [#allocation3]  }
   0x3   :  { %s27_s13 = sshll.u32 %s176_s12, 4  ;;  %s17_s15 = sshll.u32 %s177_s14, 4  ;;  %s28_s13 = int_to_ptr.vmem [resolvable:$true] %s27_s13  ;;  %s18_s15 = int_to_ptr.vmem [resolvable:$true] %s17_s15 }
   0x4   :  { %s110_s16 = scalar_lea.vmem %s28_s13, 128  ;;  %p115_p1 = scmp.lt.s32.totalorder %s28_s13, %s28_s13 }
   0x5   :  { %p111_p0 = scmp.ne.s32.totalorder %s28_s13, %s110_s16  ;;  %p116_p2 = scmp.lt.s32.totalorder %s110_s16, %s110_s16 }
   0x7   :  { %p117_p3 = por %p116_p2, %p115_p1 }
   0x9   :  { %p118_p4 = pnand %p117_p3, %p111_p0 }
   0xb   :  { %121 = shalt.err (!%p118_p4)
}
   0xc   :  { %30 = dma.hbm_to_vmem [thread:$0]  %s213_s1, 128, %s28_s13, [#allocation7]  }
   0xd   :  { %s130_s19 = scalar_lea.vmem %s18_s15, 128  ;;  %p135_p6 = scmp.lt.s32.totalorder %s18_s15, %s18_s15 }
   0xe   :  { %p131_p5 = scmp.ne.s32.totalorder %s18_s15, %s130_s19  ;;  %p136_p7 = scmp.lt.s32.totalorder %s130_s19, %s130_s19 }
  0x10   :  { %p137_p8 = por %p136_p7, %p135_p6 }
  0x12   :  { %p138_p9 = pnand %p137_p8, %p131_p5 }
  0x14   :  { %141 = shalt.err (!%p138_p9)
}
  0x15   :  { %20 = dma.hbm_to_vmem [thread:$0]  %s212_s0, 128, %s18_s15, [#allocation4]  }
  0x16   :  { %s178_s22 = smov [#allocation8]  }
  0x17   :  { %s37_s23 = sshll.u32 %s178_s22, 4  ;;  %s38_s23 = int_to_ptr.vmem [resolvable:$true] %s37_s23 }
  0x18   :  { %s150_s24 = scalar_lea.vmem %s38_s23, 128  ;;  %p155_p11 = scmp.lt.s32.totalorder %s38_s23, %s38_s23 }
  0x19   :  { %p151_p10 = scmp.ne.s32.totalorder %s38_s23, %s150_s24  ;;  %p156_p12 = scmp.lt.s32.totalorder %s150_s24, %s150_s24 }
  0x1b   :  { %p157_p13 = por %p156_p12, %p155_p11 }
  0x1d   :  { %p158_p0 = pnand %p157_p13, %p151_p10 }
  0x1f   :  { %161 = shalt.err (!%p158_p0)
}
  0x20   :  { %40 = dma.hbm_to_vmem [thread:$0]  %s214_s2, 128, %s38_s23, [#allocation7]  }
  0x21   :  { %170 = dma.done.wait [#allocation4], 128  }
  0x22   :  { %171 = vsyncadd [#allocation4], 4294967168 }
  0x23   :  { %172 = dma.done.wait [#allocation7], 256  }
  0x24   :  { %173 = vsyncadd [#allocation7], 4294967040  ;;  %v55_v0 = vld [vmem:[#allocation3] sm:$0xff]  ;;  %v56_v1 = vld [vmem:[#allocation6] sm:$0xff]  ;;  %s179_s26 = smov [#allocation9]  }
  0x25   :  { %v57_v2 = vld [vmem:[#allocation8] sm:$0xff]  ;;  %v58_v3 = vsub.f32 %v55_v0, %v56_v1 }
  0x27   :  { %v59_v4 = vmul.f32 %v58_v3, %v57_v2 }
  0x29   :  { %v60_v5 = vmul.f32 %v59_v4, %v58_v3 }
  0x2b   :  { %69 = vadd.xlane.f32.xlu0 %v60_v5 }
  0xb4   :  { %v70_v6 = vpop.xlane.xlu0 %69 }
  0xb5   :  { %v71_v7 = vrot.slane %v70_v6, 4 }
  0xb7   :  { %v72_v8 = vadd.f32 %v71_v7, %v70_v6 }
  0xb9   :  { %v73_v9 = vrot.slane %v72_v8, 2 }
  0xbb   :  { %v74_v10 = vadd.f32 %v73_v9, %v72_v8 }
  0xbd   :  { %v75_v11 = vrot.slane %v74_v10, 1 }
  0xbf   :  { %v76_v12 = vadd.f32 %v75_v11, %v74_v10 }
  0xc1   :  { %96 = vpush %v76_v12 }
  0xf2   :  { %s97_s0 = spop %96 }
  0xf3   :  { %s78_s2 = smul.f32 0.010416667, %s97_s0 }
  0xf5   :  { %80 = sst [smem:[#allocation9]] %s78_s2 }
  0xf6   :  { %88 = dma.smem_to_hbm %s179_s26, 16, %s215_s3, [#allocation5]  }
  0xf7   :  { %174 = dma.done.wait [#allocation5], 16  }
  0xf8   :  { %175 = vsyncadd [#allocation5], 4294967280 }
  0xf9   :  { %92 = sfence }
  0xfa   :  { %93 = vsyncpa [#allocation4], 1 }
  0xfb   :  { %94 = vsyncpa [#allocation7], 1 }
  0xfc   :  { %95 = vsyncpa [#allocation5], 1 }

</bundles_post_ra>
